<compile_context>
chip_gen: v7x
topology: tpu7x:2x2x1
jax: 0.10.0
libtpu: 0.0.40
codegen_flags: <defaults>
</compile_context>

<pallas_src>
import jax
import jax.numpy as jnp
from jax.experimental import pallas as pl
from jax.experimental.pallas import tpu as pltpu


def _round_up(n, m):
    return ((n + m - 1) // m) * m


def _pad_to(a, shape):
    pads = [(0, t - s) for s, t in zip(a.shape, shape)]
    return jnp.pad(a, pads)


def single_nn_kernel(x_ref, w1_ref, b1_ref, w2_ref, b2_ref, o_ref):
    # x_ref : (TB, IN_P)  f32       w1_ref: (IN_P, HID_P)  bf16
    # b1_ref: (1, HID_P)  f32       w2_ref: (HID_P, LBL_P) bf16
    # b2_ref: (1, LBL_P)  f32       o_ref : (TB, LBL_P)    bf16
    x = x_ref[...].astype(jnp.bfloat16)                     # cast on VPU, in-kernel
    h = jnp.dot(x, w1_ref[...],
                preferred_element_type=jnp.float32) + b1_ref[...]
    # dropout(p=0.5) in eval mode == identity
    h = jnp.maximum(h, 0.0)                                 # ReLU
    out = jnp.dot(h.astype(jnp.bfloat16), w2_ref[...],
                  preferred_element_type=jnp.float32) + b2_ref[...]
    o_ref[...] = out.astype(o_ref.dtype)                    # bf16 writeback


def _choose_batch_tile(B, tb_max):
    """Balanced batch tiling: minimizes zero-pad rows, >=2 steps when splittable."""
    tb_max = max(8, (tb_max // 8) * 8)                      # force multiple of 8
    B8 = _round_up(B, 8)
    num_steps = pl.cdiv(B8, tb_max)
    if num_steps == 1 and B8 >= 16:
        num_steps = 2                                       # let v7x's 2 TCs split it
    TB = _round_up(pl.cdiv(B, num_steps), 8)
    B_P = TB * num_steps
    return TB, B_P, num_steps


def make_single_nn(w1, b1, w2, b2, *, tb_max=2048):
    """w1: (HID, IN), w2: (LBL, HID) like nn.Linear. Returns a jitted forward(x)."""
    HID, IN = w1.shape
    LBL = w2.shape[0]

    # Lane-dense padded feature dims (padding is exact: zeros).
    IN_P = _round_up(IN, 128)
    HID_P = _round_up(HID, 128)
    LBL_P = _round_up(LBL, 128)

    # Weight prep hoisted out of the per-call path: (in, out) layout, bf16 for
    # the MXU, f32 biases.  Captured as constants by the jitted forward.
    w1_p = _pad_to(w1.T, (IN_P, HID_P)).astype(jnp.bfloat16)
    w2_p = _pad_to(w2.T, (HID_P, LBL_P)).astype(jnp.bfloat16)
    b1_p = _pad_to(b1.reshape(1, HID).astype(jnp.float32), (1, HID_P))
    b2_p = _pad_to(b2.reshape(1, LBL).astype(jnp.float32), (1, LBL_P))

    @jax.jit
    def forward(x):
        B = x.shape[0]
        x2d = x.reshape(B, -1)                              # == x.squeeze(1).view(B,-1)
        assert x2d.shape[1] == IN, "input features must equal width*height"

        TB, B_P, num_steps = _choose_batch_tile(B, tb_max)
        x_p = _pad_to(x2d.astype(jnp.float32), (B_P, IN_P))  # stays f32; fuses under jit

        flops = 2 * B_P * (IN_P * HID_P + HID_P * LBL_P)
        bytes_accessed = (B_P * IN_P * 4                     # x (f32)
                          + w1_p.size * 2 + w2_p.size * 2    # weights (bf16)
                          + b1_p.size * 4 + b2_p.size * 4    # biases (f32)
                          + B_P * LBL_P * 2)                 # out (bf16)

        out = pl.pallas_call(
            single_nn_kernel,
            out_shape=jax.ShapeDtypeStruct((B_P, LBL_P), jnp.bfloat16),
            grid=(num_steps,),
            in_specs=[
                pl.BlockSpec((TB, IN_P), lambda i: (i, 0)),     # x: tiled over batch
                pl.BlockSpec((IN_P, HID_P), lambda i: (0, 0)),  # weights VMEM-resident
                pl.BlockSpec((1, HID_P), lambda i: (0, 0)),
                pl.BlockSpec((HID_P, LBL_P), lambda i: (0, 0)),
                pl.BlockSpec((1, LBL_P), lambda i: (0, 0)),
            ],
            out_specs=pl.BlockSpec((TB, LBL_P), lambda i: (i, 0)),
            compiler_params=pltpu.CompilerParams(
                dimension_semantics=("parallel",),              # shard batch tiles
            ),
            cost_estimate=pl.CostEstimate(
                flops=flops, transcendentals=0, bytes_accessed=bytes_accessed),
        )(x_p, w1_p, b1_p, w2_p, b2_p)

        return out[:B, :LBL].astype(jnp.float32)

    return forward


def _reference(x, w1, b1, w2, b2):
    """Pure-JAX reference mimicking the kernel's bf16-in / f32-accum / bf16-out path."""
    B = x.shape[0]
    x2d = x.reshape(B, -1)
    xb = x2d.astype(jnp.bfloat16).astype(jnp.float32)
    w1b = w1.astype(jnp.bfloat16).astype(jnp.float32)
    w2b = w2.astype(jnp.bfloat16).astype(jnp.float32)
    h = jnp.maximum(xb @ w1b.T + b1, 0.0)
    hb = h.astype(jnp.bfloat16).astype(jnp.float32)
    out = hb @ w2b.T + b2
    return out.astype(jnp.bfloat16).astype(jnp.float32)


if __name__ == "__main__":
    # SingleNN(batch_size=2, width=16, height=16, hidden_size=32, label_tot=8)
    batch_size, width, height, hidden_size, label_tot = 2, 16, 16, 32, 8
    in_features = width * height

    key = jax.random.PRNGKey(0)
    kx, kw1, kb1, kw2, kb2, kx2 = jax.random.split(key, 6)

    x = jax.random.normal(kx, (batch_size, 1, height, width), dtype=jnp.float32)

    # PyTorch-style uniform(-1/sqrt(fan_in), 1/sqrt(fan_in)) init, (out, in) layout.
    bound1 = 1.0 / (in_features ** 0.5)
    w1 = jax.random.uniform(kw1, (hidden_size, in_features), jnp.float32,
                            -bound1, bound1)
    b1 = jax.random.uniform(kb1, (hidden_size,), jnp.float32, -bound1, bound1)

    bound2 = 1.0 / (hidden_size ** 0.5)
    w2 = jax.random.uniform(kw2, (label_tot, hidden_size), jnp.float32,
                            -bound2, bound2)
    b2 = jax.random.uniform(kb2, (label_tot,), jnp.float32, -bound2, bound2)

    forward = make_single_nn(w1, b1, w2, b2)

    # Small-batch run (B=2 -> one 8-row tile, grid=(1,)).
    out = forward(x)
    jax.block_until_ready(out)
    ref = _reference(x, w1, b1, w2, b2)
    assert out.shape == (batch_size, label_tot)
    assert jnp.allclose(out, ref, atol=2e-3, rtol=2e-3)

    # Larger, non-multiple batch: balanced tiling -> TB=152, B_P=304, grid=(2,).
    B2 = 300
    x_big = jax.random.normal(kx2, (B2, 1, height, width), dtype=jnp.float32)
    out_big = forward(x_big)
    jax.block_until_ready(out_big)
    ref_big = _reference(x_big, w1, b1, w2, b2)
    assert out_big.shape == (B2, label_tot)
    assert jnp.allclose(out_big, ref_big, atol=2e-3, rtol=2e-3)

    print("KERNEL_OK")
</pallas_src>

<mosaic_0001>
module attributes {stable_mosaic.version = 11 : i64} {
  func.func @single_nn_kernel(%arg0: i32, %arg1: memref<8x256xf32, #tpu.memory_space<vmem>>, %arg2: memref<256x128xbf16, #tpu.memory_space<vmem>>, %arg3: memref<1x128xf32, #tpu.memory_space<vmem>>, %arg4: memref<128x128xbf16, #tpu.memory_space<vmem>>, %arg5: memref<1x128xf32, #tpu.memory_space<vmem>>, %arg6: memref<8x128xbf16, #tpu.memory_space<vmem>>) attributes {dimension_semantics = [#tpu.dimension_semantics<parallel>], iteration_bounds = array<i64: 1>, scalar_prefetch = 0 : i64, scratch_operands = 0 : i64, tpu.core_type = #tpu.core_type<tc>, window_params = [{transform_indices = @transform_0, window_bounds = array<i64: 8, 256>}, {pipeline_mode = #tpu.pipeline_mode<synchronous>, transform_indices = @transform_1, window_bounds = array<i64: 256, 128>}, {pipeline_mode = #tpu.pipeline_mode<synchronous>, transform_indices = @transform_2, window_bounds = array<i64: 1, 128>}, {pipeline_mode = #tpu.pipeline_mode<synchronous>, transform_indices = @transform_3, window_bounds = array<i64: 128, 128>}, {pipeline_mode = #tpu.pipeline_mode<synchronous>, transform_indices = @transform_4, window_bounds = array<i64: 1, 128>}, {transform_indices = @transform_5, window_bounds = array<i64: 8, 128>}]} {
    %c0 = arith.constant 0 : index
    %c0_0 = arith.constant 0 : index
    %0 = vector.load %arg1[%c0, %c0_0] : memref<8x256xf32, #tpu.memory_space<vmem>>, vector<8x256xf32>
    %1 = arith.truncf %0 : vector<8x256xf32> to vector<8x256xbf16>
    %c0_1 = arith.constant 0 : index
    %c0_2 = arith.constant 0 : index
    %2 = vector.load %arg2[%c0_1, %c0_2] : memref<256x128xbf16, #tpu.memory_space<vmem>>, vector<256x128xbf16>
    %cst = arith.constant dense<0.000000e+00> : vector<8x128xf32>
    %3 = tpu.matmul %1, %2, %cst {dimension_numbers = #tpu.dot_dimension_numbers<[1], [0], [0], [1], [0, 0, 1, 1], [], []>} : vector<8x256xbf16>, vector<256x128xbf16>, vector<8x128xf32> -> vector<8x128xf32>
    %c0_3 = arith.constant 0 : index
    %c0_4 = arith.constant 0 : index
    %4 = vector.load %arg3[%c0_3, %c0_4] : memref<1x128xf32, #tpu.memory_space<vmem>>, vector<1x128xf32>
    %5 = vector.broadcast %4 : vector<1x128xf32> to vector<8x128xf32>
    %6 = arith.addf %3, %5 : vector<8x128xf32>
    %cst_5 = arith.constant 0.000000e+00 : f32
    %7 = vector.broadcast %cst_5 : f32 to vector<8x128xf32>
    %8 = arith.maximumf %6, %7 : vector<8x128xf32>
    %9 = arith.truncf %8 : vector<8x128xf32> to vector<8x128xbf16>
    %c0_6 = arith.constant 0 : index
    %c0_7 = arith.constant 0 : index
    %10 = vector.load %arg4[%c0_6, %c0_7] : memref<128x128xbf16, #tpu.memory_space<vmem>>, vector<128x128xbf16>
    %cst_8 = arith.constant dense<0.000000e+00> : vector<8x128xf32>
    %11 = tpu.matmul %9, %10, %cst_8 {dimension_numbers = #tpu.dot_dimension_numbers<[1], [0], [0], [1], [0, 0, 1, 1], [], []>} : vector<8x128xbf16>, vector<128x128xbf16>, vector<8x128xf32> -> vector<8x128xf32>
    %c0_9 = arith.constant 0 : index
    %c0_10 = arith.constant 0 : index
    %12 = vector.load %arg5[%c0_9, %c0_10] : memref<1x128xf32, #tpu.memory_space<vmem>>, vector<1x128xf32>
    %13 = vector.broadcast %12 : vector<1x128xf32> to vector<8x128xf32>
    %14 = arith.addf %11, %13 : vector<8x128xf32>
    %15 = arith.truncf %14 : vector<8x128xf32> to vector<8x128xbf16>
    %c0_11 = arith.constant 0 : index
    %c0_12 = arith.constant 0 : index
    %16 = vector.load %arg6[%c0_11, %c0_12] : memref<8x128xbf16, #tpu.memory_space<vmem>>, vector<8x128xbf16>
    tpu.vector_store %arg6[%c0_11, %c0_12], %15 {strides = array<i32>} : memref<8x128xbf16, #tpu.memory_space<vmem>>, vector<8x128xbf16>,
    return
  }
  func.func @transform_0(%arg0: i32) -> (i32, i32) {
    %c0_i32 = arith.constant 0 : i32
    %c0_i32_0 = arith.constant 0 : i32
    return %arg0, %c0_i32 : i32, i32
  }
  func.func @transform_1(%arg0: i32) -> (i32, i32) {
    %c0_i32 = arith.constant 0 : i32
    %c0_i32_0 = arith.constant 0 : i32
    %c0_i32_1 = arith.constant 0 : i32
    return %c0_i32, %c0_i32_0 : i32, i32
  }
  func.func @transform_2(%arg0: i32) -> (i32, i32) {
    %c0_i32 = arith.constant 0 : i32
    %c0_i32_0 = arith.constant 0 : i32
    %c0_i32_1 = arith.constant 0 : i32
    return %c0_i32, %c0_i32_0 : i32, i32
  }
  func.func @transform_3(%arg0: i32) -> (i32, i32) {
    %c0_i32 = arith.constant 0 : i32
    %c0_i32_0 = arith.constant 0 : i32
    %c0_i32_1 = arith.constant 0 : i32
    return %c0_i32, %c0_i32_0 : i32, i32
  }
  func.func @transform_4(%arg0: i32) -> (i32, i32) {
    %c0_i32 = arith.constant 0 : i32
    %c0_i32_0 = arith.constant 0 : i32
    %c0_i32_1 = arith.constant 0 : i32
    return %c0_i32, %c0_i32_0 : i32, i32
  }
  func.func @transform_5(%arg0: i32) -> (i32, i32) {
    %c0_i32 = arith.constant 0 : i32
    %c0_i32_0 = arith.constant 0 : i32
    return %arg0, %c0_i32 : i32, i32
  }
}

</mosaic_0001>

<bundles_post_ra>
// kernel: forward.1
= control target key start
LH: loop header
LB: loop body
LE: loop exit
PB: predicated region body
PF: predicated region fallthrough
CT: control target
= control target key end

     0   :  { %10 = vsyncpa [#allocation3], 0  ;;  %s464_s18 = smov [#allocation2]   ;;  %s559_s0 = inlined_call_operand.vmem [shape: f32[8,256], index: 0, kind: input, shape index: {}]   ;;  %s560_s1 = inlined_call_operand.hbm [shape: bf16[256,128], index: 1, kind: input, shape index: {}]   ;;  %s561_s2 = inlined_call_operand.vmem [shape: f32[1,128], index: 2, kind: input, shape index: {}]   ;;  %s562_s3 = inlined_call_operand.vmem [shape: bf16[128,128], index: 3, kind: input, shape index: {}]   ;;  %s563_s4 = inlined_call_operand.vmem [shape: f32[1,128], index: 4, kind: input, shape index: {}]   ;;  %s564_s5 = inlined_call_operand.vmem [shape: bf16[8,128], index: 5, kind: output, shape index: {}]  }
   0x1   :  { %s18_s19 = sshll.u32 %s464_s18, 4  ;;  %s440_s22 = scalar_lea.hbm %s560_s1, 2048  ;;  %s19_s19 = int_to_ptr.vmem [resolvable:$true] %s18_s19 }
   0x2   :  { %p441_p0 = scmp.ne.s32.totalorder %s560_s1, %s440_s22  ;;  %p444_p1 = scmp.lt.u32.totalorder %s440_s22, %s560_s1 }
   0x4   :  { %p446_p2 = pnand %p444_p1, %p441_p0 }
   0x6   :  { %449 = shalt.err (!%p446_p2)
}
   0x7   :  { %s450_s27 = scalar_lea.vmem %s19_s19, 2048  ;;  %p455_p4 = scmp.lt.s32.totalorder %s19_s19, %s19_s19 }
   0x8   :  { %p451_p3 = scmp.ne.s32.totalorder %s19_s19, %s450_s27  ;;  %p456_p5 = scmp.lt.s32.totalorder %s450_s27, %s450_s27 }
   0xa   :  { %p457_p6 = por %p456_p5, %p455_p4 }
   0xc   :  { %p458_p7 = pnand %p457_p6, %p451_p3 }
   0xe   :  { %461 = shalt.err (!%p458_p7)
}
   0xf   :  { %s465_s28 = smov 64   ;;  %s466_s29 = smov 4  }
  0x10   :  { %24 = dma.hbm_to_vmem [thread:$0]  %s560_s1, 2048, %s19_s19, [#allocation3], %s465_s28, %s465_s28, %s466_s29  }
  0x11   :  { %462 = dma.done.wait [#allocation3], 2048  }
  0x12   :  { %463 = vsyncadd [#allocation3], 4294965248  ;;  %v467_v0 = vmov 0.0   ;;  %v416_v1 = vld [vmem:[#allocation2 + $0x40] sm:$0xff]   ;;  %v418_v3 = vld [vmem:[#allocation2 + $0x48] sm:$0xff]   ;;  %vm468_vm0 = vmmov 0  }
  0x13   :  { %391 = vmatprep.subr.bf16.mxu1 %v467_v0  ;;  %v417_v2 = vld [vmem:[#allocation2] sm:$0xff]   ;;  %360 = vmatprep.subr.bf16.mxu0 %v416_v1  ;;  %v419_v4 = vld [vmem:[#allocation2 + $0x8] sm:$0xff]   ;;  %v420_v5 = vld [vmem:[#allocation2 + $0x50] sm:$0xff]  }
  0x14   :  { %361 = vmatpush3.bf16.msra.mxu0 %v417_v2  ;;  %v421_v6 = vld [vmem:[#allocation2 + $0x10] sm:$0xff]   ;;  %v422_v7 = vld [vmem:[#allocation2 + $0x58] sm:$0xff]   ;;  %v424_v9 = vld [vmem:[#allocation2 + $0x60] sm:$0xff]   ;;  %407 = vmatprep.mubr.msk.bf16.mxu1 %vm468_vm0, %v467_v0 }
  0x15   :  { %362 = vmatprep.subr.bf16.mxu0 %v418_v3  ;;  %v423_v8 = vld [vmem:[#allocation2 + $0x18] sm:$0xff]   ;;  %v425_v10 = vld [vmem:[#allocation2 + $0x20] sm:$0xff]   ;;  %v426_v11 = vld [vmem:[#allocation2 + $0x68] sm:$0xff]  }
  0x16   :  { %v36_v12 = vld [vmem:[%s559_s0 + $0x8] sm:$0xff]  ;;  %v432_v14 = vld [vmem:[%s562_s3] sm:$0xff]   ;;  %v428_v16 = vld [vmem:[#allocation2 + $0x70] sm:$0xff]  }
  0x17   :  { %v38_v13 = vpack.c.bf16 %v36_v12, %v36_v12  ;;  %v427_v15 = vld [vmem:[#allocation2 + $0x28] sm:$0xff]   ;;  %392 = vmatpush3.bf16.msra.mxu1 %v432_v14  ;;  %v429_v18 = vld [vmem:[#allocation2 + $0x30] sm:$0xff]   ;;  %v430_v19 = vld [vmem:[#allocation2 + $0x78] sm:$0xff]  }
  0x18   :  { %363 = vmatpush3.bf16.msra.mxu0 %v419_v4  ;;  %v433_v17 = vld [vmem:[%s562_s3 + $0x8] sm:$0xff]   ;;  %393 = vmatprep.subr.bf16.mxu1 %v467_v0  ;;  %v434_v20 = vld [vmem:[%s562_s3 + $0x10] sm:$0xff]   ;;  %v431_v21 = vld [vmem:[#allocation2 + $0x38] sm:$0xff]  }
  0x19   :  { %364 = vmatprep.subr.bf16.mxu0 %v420_v5  ;;  %206 = vmatprep.mubr.bf16.mxu0 %v38_v13  ;;  %v35_v22 = vld [vmem:[%s559_s0] sm:$0xff]  ;;  %v435_v23 = vld [vmem:[%s562_s3 + $0x18] sm:$0xff]   ;;  %v437_v26 = vld [vmem:[%s562_s3 + $0x28] sm:$0xff]  }
  0x1a   :  { %v37_v24 = vpack.c.bf16 %v35_v22, %v35_v22  ;;  %v436_v25 = vld [vmem:[%s562_s3 + $0x20] sm:$0xff]   ;;  %v438_v27 = vld [vmem:[%s562_s3 + $0x30] sm:$0xff]   ;;  %v439_v28 = vld [vmem:[%s562_s3 + $0x38] sm:$0xff]  }
  0x1b   :  { %394 = vmatpush3.bf16.msra.mxu1 %v433_v17  ;;  %v334_v30 = vld [vmem:[%s561_s2] ss:$0 sm:$0xff] }
  0x1c   :  { %365 = vmatpush3.bf16.msra.mxu0 %v421_v6  ;;  %395 = vmatprep.subr.bf16.mxu1 %v467_v0  ;;  %v351_v38 = vld [vmem:[%s563_s4] ss:$0 sm:$0xff] }
  0x1d   :  { %366 = vmatprep.subr.bf16.mxu0 %v422_v7 }
  0x1f   :  { %396 = vmatpush3.bf16.msra.mxu1 %v434_v20 }
  0x20   :  { %367 = vmatpush3.bf16.msra.mxu0 %v423_v8  ;;  %397 = vmatprep.subr.bf16.mxu1 %v467_v0 }
  0x21   :  { %368 = vmatprep.subr.bf16.mxu0 %v424_v9 }
  0x23   :  { %398 = vmatpush3.bf16.msra.mxu1 %v435_v23 }
  0x24   :  { %369 = vmatpush3.bf16.msra.mxu0 %v425_v10  ;;  %399 = vmatprep.subr.bf16.mxu1 %v467_v0 }
  0x25   :  { %370 = vmatprep.subr.bf16.mxu0 %v426_v11 }
  0x27   :  { %400 = vmatpush3.bf16.msra.mxu1 %v436_v25 }
  0x28   :  { %371 = vmatpush3.bf16.msra.mxu0 %v427_v15  ;;  %401 = vmatprep.subr.bf16.mxu1 %v467_v0 }
  0x29   :  { %372 = vmatprep.subr.bf16.mxu0 %v428_v16 }
  0x2b   :  { %402 = vmatpush3.bf16.msra.mxu1 %v437_v26 }
  0x2c   :  { %373 = vmatpush3.bf16.msra.mxu0 %v429_v18  ;;  %403 = vmatprep.subr.bf16.mxu1 %v467_v0 }
  0x2d   :  { %374 = vmatprep.subr.bf16.mxu0 %v430_v19 }
  0x2f   :  { %404 = vmatpush3.bf16.msra.mxu1 %v438_v27 }
  0x30   :  { %375 = vmatpush3.bf16.msra.mxu0 %v431_v21  ;;  %405 = vmatprep.subr.bf16.mxu1 %v467_v0 }
  0x33   :  { %207 = vmatmul.mubr.bf16.vlgmr.msra.gmra.mrb[0].mxu0 %v37_v24  ;;  %406 = vmatpush3.bf16.msra.mxu1 %v439_v28 }
 0x106   :  { %v376_v29 = vpop.f32.mrb[0].mxu0 }
 0x107   :  { %v377_v31 = vpop.f32.mrb[1].mxu0 }
 0x108   :  { %v378_v32 = vadd.f32 %v377_v31, %v376_v29  ;;  %v379_v33 = vpop.f32.mrb[2].mxu0 }
 0x109   :  { %v380_v34 = vpop.f32.mrb[3].mxu0 }
 0x10a   :  { %v209_v35 = vadd.f32 %v378_v32, %v334_v30 }
 0x10c   :  { %v214_v36 = vmax.f32 %v209_v35, 0.0 }
 0x10e   :  { %v215_v37 = vpack.c.bf16 %v214_v36, %v214_v36 }
 0x110   :  { %408 = vmatmul.mubr.bf16.vlgmr.msra.gmra.mrb[0].mxu1 %v215_v37 }
 0x1e3   :  { %v321_v39 = vpop.f32.mrb[0].mxu1 }
 0x1e4   :  { %v322_v40 = vadd.f32 %v351_v38, %v321_v39  ;;  %v409_v41 = vpop.f32.mrb[1].mxu1 }
 0x1e5   :  { %v324_v42 = vpop.f32.mrb[2].mxu1 }
 0x1e6   :  { %v327_v43 = vpack.c.bf16 %v322_v40, %v322_v40  ;;  %v410_v44 = vpop.f32.mrb[3].mxu1 }
 0x1e8   :  { %328 = vst [vmem:[%s564_s5] sm:$0xf] %v327_v43 }
 0x1e9   :  { %333 = vsyncpa [#allocation3], 1 }

</bundles_post_ra>
